<compile_context>
chip_gen: v7x
topology: tpu7x:2x2x1
jax: 0.10.0
libtpu: 0.0.40
codegen_flags: <defaults>
</compile_context>

<pallas_src>
import functools

import jax
import jax.numpy as jnp
from jax.experimental import pallas as pl
from jax.experimental.pallas import tpu as pltpu


# ----------------------------------------------------------------------------
# Pallas kernel
# ----------------------------------------------------------------------------
def _se_kernel(x_ref, wsq_ref, wex_ref, o_ref, *, inv_hw, channels):
    """Fused SE block for a block of BB batch samples.

    x_ref   : (BB, C, HW)  input, NCHW with H,W flattened (lane-dense HW)
    wsq_ref : (C, Ch)      squeeze weight, transposed (y = x @ W)
    wex_ref : (Ch, 2C)     expand weight, transposed; cols [0:C]=gamma, [C:2C]=beta
    o_ref   : (BB, C, HW)  gamma * x + beta, same dtype as x
    """
    x = x_ref[...]                                           # (BB, C, HW)

    # AdaptiveAvgPool2d(1): mean over the spatial (lane) axis, accumulate f32.
    pooled = jnp.sum(x.astype(jnp.float32), axis=-1) * inv_hw       # (BB, C)

    # squeeze: Linear(C -> C//r, bias=False) + ReLU
    squeezed = jnp.maximum(
        jnp.dot(pooled, wsq_ref[...], preferred_element_type=jnp.float32),
        0.0)                                                         # (BB, Ch)

    # expand: one Linear(C//r -> 2C, bias=False); split gamma/beta in-vreg.
    expanded = jnp.dot(squeezed, wex_ref[...],
                       preferred_element_type=jnp.float32)           # (BB, 2C)
    gam = jax.nn.sigmoid(expanded[:, :channels])                     # (BB, C)
    bet = expanded[:, channels:]                                     # (BB, C)

    # Per-channel affine over the spatial axis; compute in f32, store in x dtype.
    o_ref[...] = (gam[:, :, None] * x + bet[:, :, None]).astype(o_ref.dtype)


# ----------------------------------------------------------------------------
# Block-size heuristic (batch samples per grid step)
# ----------------------------------------------------------------------------
def _pick_block_batch(B, C, HW, itemsize):
    # VMEM budget for the pipelined x/out blocks: 2 (double-buffer) x (in+out).
    # Stays well under v7x's 32 MiB scoped default (64 MiB physical).
    budget_bytes = 16 * 1024 * 1024
    per_sample = 4 * C * HW * itemsize
    bb_cap = max(1, budget_bytes // per_sample)
    # Keep >= 2 parallel grid steps when B >= 2 so both v7x TensorCores work.
    target = B if B < 2 else -(-B // 2)            # ceil(B / 2)
    bb = max(1, min(target, bb_cap, B))
    # Round down to a divisor of B so blocks tile evenly (no padding logic).
    while B % bb:
        bb -= 1
    return bb


# ----------------------------------------------------------------------------
# Wrapper (layout / weight-prep glue, all trace-time)
# ----------------------------------------------------------------------------
def squeeze_excitation_pallas(x_nchw, w_squeeze, w_expand, *, block_batch=None):
    """x_nchw: (B, C, H, W); w_squeeze: (C//r, C); w_expand: (2C, C//r).

    Keeps the caller's activation dtype end-to-end (no f32 upcast)."""
    B, C, H, W = x_nchw.shape
    HW = H * W
    hidden = w_squeeze.shape[0]
    assert w_expand.shape == (2 * C, hidden)

    x_flat = x_nchw.reshape(B, C, HW)                 # free trailing-dim merge

    # One-time weight prep: transpose PyTorch Linear weights (y = x @ W.T).
    # The expand weight stays a single (Ch, 2C) operand (gamma cols | beta cols).
    wsq_t = jnp.transpose(w_squeeze)                  # (C, Ch)
    wex_t = jnp.transpose(w_expand)                   # (Ch, 2C)

    bb = block_batch or _pick_block_batch(B, C, HW, x_flat.dtype.itemsize)
    num_blocks = B // bb

    kernel = functools.partial(_se_kernel, inv_hw=1.0 / HW, channels=C)

    out = pl.pallas_call(
        kernel,
        out_shape=jax.ShapeDtypeStruct((B, C, HW), x_flat.dtype),
        grid=(num_blocks,),
        in_specs=[
            pl.BlockSpec((bb, C, HW), lambda b: (b, 0, 0)),
            pl.BlockSpec((C, hidden), lambda b: (0, 0)),      # constant index:
            pl.BlockSpec((hidden, 2 * C), lambda b: (0, 0)),  # DMA'd once
        ],
        out_specs=pl.BlockSpec((bb, C, HW), lambda b: (b, 0, 0)),
        compiler_params=pltpu.CompilerParams(
            dimension_semantics=("parallel",)),
    )(x_flat, wsq_t, wex_t)

    return out.reshape(B, C, H, W)


# ----------------------------------------------------------------------------
# Pure-JAX reference (for validation)
# ----------------------------------------------------------------------------
def squeeze_excitation_ref(x, w_squeeze, w_expand):
    B, C, H, W = x.shape
    pooled = jnp.mean(x.astype(jnp.float32), axis=(2, 3))     # (B, C)
    squeezed = jnp.maximum(pooled @ w_squeeze.T, 0.0)         # (B, C//r)
    expanded = squeezed @ w_expand.T                          # (B, 2C)
    gam, bet = expanded[:, :C], expanded[:, C:]
    gam = jax.nn.sigmoid(gam)
    out = gam[:, :, None, None] * x.astype(jnp.float32) + bet[:, :, None, None]
    return out.astype(x.dtype)


# ----------------------------------------------------------------------------
# Main
# ----------------------------------------------------------------------------
if __name__ == "__main__":
    B = 2
    C = 32           # channels
    SE_RATIO = 4
    HID = C // SE_RATIO
    H = W = 16

    key = jax.random.PRNGKey(0)
    k1, k2, k3 = jax.random.split(key, 3)

    # xavier_normal_ init, matching nn.init.xavier_normal_
    std_sq = (2.0 / (C + HID)) ** 0.5
    w_squeeze = jax.random.normal(k1, (HID, C), jnp.float32) * std_sq
    std_ex = (2.0 / (HID + 2 * C)) ** 0.5
    w_expand = jax.random.normal(k2, (2 * C, HID), jnp.float32) * std_ex

    x = jax.random.normal(k3, (B, C, H, W), jnp.float32)

    out = squeeze_excitation_pallas(x, w_squeeze, w_expand)
    out = jax.block_until_ready(out)

    ref = squeeze_excitation_ref(x, w_squeeze, w_expand)
    rel_err = float(jnp.max(jnp.abs(out - ref)) /
                    (jnp.max(jnp.abs(ref)) + 1e-6))
    assert out.shape == (B, C, H, W), out.shape
    assert out.dtype == x.dtype, out.dtype
    assert rel_err < 1e-3, f"relative error too large: {rel_err}"

    print("KERNEL_OK")
</pallas_src>

<mosaic_0001>
module attributes {stable_mosaic.version = 11 : i64} {
  func.func @_se_kernel(%arg0: i32, %arg1: memref<1x32x256xf32, #tpu.memory_space<vmem>>, %arg2: memref<32x8xf32, #tpu.memory_space<vmem>>, %arg3: memref<8x64xf32, #tpu.memory_space<vmem>>, %arg4: memref<1x32x256xf32, #tpu.memory_space<vmem>>) attributes {dimension_semantics = [#tpu.dimension_semantics<parallel>], iteration_bounds = array<i64: 2>, scalar_prefetch = 0 : i64, scratch_operands = 0 : i64, tpu.core_type = #tpu.core_type<tc>, window_params = [{transform_indices = @transform_0, window_bounds = array<i64: 1, 32, 256>}, {pipeline_mode = #tpu.pipeline_mode<synchronous>, transform_indices = @transform_1, window_bounds = array<i64: 32, 8>}, {pipeline_mode = #tpu.pipeline_mode<synchronous>, transform_indices = @transform_2, window_bounds = array<i64: 8, 64>}, {transform_indices = @transform_3, window_bounds = array<i64: 1, 32, 256>}]} {
    %c0 = arith.constant 0 : index
    %c0_0 = arith.constant 0 : index
    %c0_1 = arith.constant 0 : index
    %0 = vector.load %arg1[%c0, %c0_0, %c0_1] : memref<1x32x256xf32, #tpu.memory_space<vmem>>, vector<1x32x256xf32>
    %cst = arith.constant dense<0.000000e+00> : vector<1x32xf32>
    %1 = vector.multi_reduction <add>, %0, %cst [2] : vector<1x32x256xf32> to vector<1x32xf32>
    %cst_2 = arith.constant 3.906250e-03 : f32
    %2 = vector.broadcast %cst_2 : f32 to vector<1x32xf32>
    %3 = arith.mulf %1, %2 : vector<1x32xf32>
    %c0_3 = arith.constant 0 : index
    %c0_4 = arith.constant 0 : index
    %4 = vector.load %arg2[%c0_3, %c0_4] : memref<32x8xf32, #tpu.memory_space<vmem>>, vector<32x8xf32>
    %cst_5 = arith.constant dense<0.000000e+00> : vector<1x8xf32>
    %5 = tpu.matmul %3, %4, %cst_5 {dimension_numbers = #tpu.dot_dimension_numbers<[1], [0], [0], [1], [0, 0, 1, 1], [], []>} : vector<1x32xf32>, vector<32x8xf32>, vector<1x8xf32> -> vector<1x8xf32>
    %cst_6 = arith.constant 0.000000e+00 : f32
    %6 = vector.broadcast %cst_6 : f32 to vector<1x8xf32>
    %7 = arith.maximumf %5, %6 : vector<1x8xf32>
    %c0_7 = arith.constant 0 : index
    %c0_8 = arith.constant 0 : index
    %8 = vector.load %arg3[%c0_7, %c0_8] : memref<8x64xf32, #tpu.memory_space<vmem>>, vector<8x64xf32>
    %cst_9 = arith.constant dense<0.000000e+00> : vector<1x64xf32>
    %9 = tpu.matmul %7, %8, %cst_9 {dimension_numbers = #tpu.dot_dimension_numbers<[1], [0], [0], [1], [0, 0, 1, 1], [], []>} : vector<1x8xf32>, vector<8x64xf32>, vector<1x64xf32> -> vector<1x64xf32>
    %10 = vector.extract_strided_slice %9 {offsets = [0, 0], sizes = [1, 32], strides = [1, 1]} : vector<1x64xf32> to vector<1x32xf32>
    %11 = arith.negf %10 : vector<1x32xf32>
    %12 = math.exp %11 : vector<1x32xf32>
    %cst_10 = arith.constant 1.000000e+00 : f32
    %13 = vector.broadcast %cst_10 : f32 to vector<1x32xf32>
    %14 = arith.addf %13, %12 : vector<1x32xf32>
    %15 = arith.divf %13, %14 : vector<1x32xf32>
    %16 = vector.extract_strided_slice %9 {offsets = [0, 32], sizes = [1, 32], strides = [1, 1]} : vector<1x64xf32> to vector<1x32xf32>
    %17 = vector.shape_cast %15 : vector<1x32xf32> to vector<1x32x1xf32>
    %18 = vector.broadcast %17 : vector<1x32x1xf32> to vector<1x32x256xf32>
    %19 = arith.mulf %18, %0 : vector<1x32x256xf32>
    %20 = vector.shape_cast %16 : vector<1x32xf32> to vector<1x32x1xf32>
    %21 = vector.broadcast %20 : vector<1x32x1xf32> to vector<1x32x256xf32>
    %22 = arith.addf %19, %21 : vector<1x32x256xf32>
    %c0_11 = arith.constant 0 : index
    %c0_12 = arith.constant 0 : index
    %c0_13 = arith.constant 0 : index
    %23 = vector.load %arg4[%c0_11, %c0_12, %c0_13] : memref<1x32x256xf32, #tpu.memory_space<vmem>>, vector<1x32x256xf32>
    tpu.vector_store %arg4[%c0_11, %c0_12, %c0_13], %22 {strides = array<i32>} : memref<1x32x256xf32, #tpu.memory_space<vmem>>, vector<1x32x256xf32>,
    return
  }
  func.func @transform_0(%arg0: i32) -> (i32, i32, i32) {
    %c0_i32 = arith.constant 0 : i32
    %c0_i32_0 = arith.constant 0 : i32
    %c0_i32_1 = arith.constant 0 : i32
    return %arg0, %c0_i32, %c0_i32_0 : i32, i32, i32
  }
  func.func @transform_1(%arg0: i32) -> (i32, i32) {
    %c0_i32 = arith.constant 0 : i32
    %c0_i32_0 = arith.constant 0 : i32
    %c0_i32_1 = arith.constant 0 : i32
    return %c0_i32, %c0_i32_0 : i32, i32
  }
  func.func @transform_2(%arg0: i32) -> (i32, i32) {
    %c0_i32 = arith.constant 0 : i32
    %c0_i32_0 = arith.constant 0 : i32
    %c0_i32_1 = arith.constant 0 : i32
    return %c0_i32, %c0_i32_0 : i32, i32
  }
  func.func @transform_3(%arg0: i32) -> (i32, i32, i32) {
    %c0_i32 = arith.constant 0 : i32
    %c0_i32_0 = arith.constant 0 : i32
    %c0_i32_1 = arith.constant 0 : i32
    return %arg0, %c0_i32, %c0_i32_0 : i32, i32, i32
  }
}

</mosaic_0001>

<bundles_post_ra>
// kernel: tpu_custom_call.1
= control target key start
LH: loop header
LB: loop body
LE: loop exit
PB: predicated region body
PF: predicated region fallthrough
CT: control target
= control target key end

     0   :  { %8 = vsyncpa [#allocation3], 0  ;;  %s998_s0 = inlined_call_operand.hbm [shape: f32[2,32,256], index: 0, kind: input, shape index: {}]   ;;  %s999_s1 = inlined_call_operand.vmem [shape: f32[32,8], index: 1, kind: input, shape index: {}]   ;;  %s1000_s2 = inlined_call_operand.vmem [shape: f32[8,64], index: 2, kind: input, shape index: {}]   ;;  %s1001_s3 = inlined_call_operand.hbm [shape: f32[2,32,256], index: 3, kind: output, shape index: {}]  }
   0x1   :  { %10 = vsyncpa [#allocation3 + $0x1], 0 }
   0x2   :  { %11 = vsyncpa [#allocation4], 0 }
   0x3   :  { %13 = vsyncpa [#allocation4 + $0x1], 0  ;;  %s785_s12 = smov 0   ;;  %s787_s13 = smov 0  }
   0x4   :  { %s789_s14 = smov 0   ;;  %s791_s15 = smov 0  }
   0x5 LB: > { %s806_s16 = sadd.s32 4294967295, %s754_s15   ;;  %s553_s17 = sadd.s32 4294967294, %s754_s15   ;;  %s754_s15 = sphi %s791_s15, %s1014_s15   ;;  %s750_s14 = sphi %s789_s14, %s1013_s14   ;;  %s746_s13 = sphi %s787_s13, %s1012_s13   ;;  %s742_s12 = sphi %s785_s12, %s1011_s12  }
   0x6   : > { %s810_s18 = sadd.s32 1, %s754_s15   ;;  %s26_s19 = sadd.s32 1, %s750_s14 }
   0x7   : > { %s23_s20 = ssub.s32 %s754_s15, %s810_s18  ;;  %p33_p0 = scmp.ne.s32.totalorder %s750_s14, %s746_s13 }
   0x8   : > { %p24_p1 = scmp.eq.s32.totalorder %s23_s20, 0  ;;  %p34_p2 = scmp.eq.s32.totalorder %s754_s15, 0 }
   0x9   : > { %p39_p3 = scmp.ne.s32.totalorder %s746_s13, %s742_s12  ;;  %p40_p4 = scmp.eq.s32.totalorder %s806_s16, 0 }
   0xa   : > { %s822_s21 = scalar_select %p24_p1, %s750_s14, %s26_s19  }
   0xb   : > { %p824_p5 = por %p34_p2, %p33_p0  ;;  %p828_p6 = por %p40_p4, %p39_p3 }
   0xc   : > { %p105_p7 = scmp.eq.s32.totalorder %s806_s16, 1  ;;  %p111_p8 = scmp.eq.s32.totalorder %s553_s17, 1 }
   0xd   : > { %p613_p10 = scmp.lt.s32.totalorder %s754_s15, 2  ;;  %s137_s26 = sand.u32 1, %s750_s14  }
   0xe   : > { %p835_p11 = por %p105_p7, %p33_p0  ;;  %p839_p12 = por %p111_p8, %p39_p3 }
   0xf   : > { %s570_s27 = sshll.u32 %s754_s15, 10  ;;  %s556_s28 = sshll.u32 %s137_s26, 6 }
  0x10   : > { %s1005_s24 = scalar_select %p835_p11, 1, 0 }
  0x11   : > { %s1006_s25 = scalar_select %p839_p12, 1, 0 }
  0x12   : > { %s848_s4 = scalar_lea.hbm %s998_s0, %s570_s27  ;;  %s141_s5 = scalar_lea.vmem [#allocation2], %s556_s28 }
  0x13   : > { %s148_s6 = sshll.u32 %s141_s5, 4  ;;  %p852_p13 = pnand %p613_p10, %p824_p5  ;;  %s856_s6 = int_to_ptr.vmem [resolvable:$true] %s148_s6 }
  0x14   : > { %s858_s8 = scalar_lea.sflag [#allocation3], %s137_s26  ;;  %s658_s9 = scalar_lea.hbm %s848_s4, 1024 }
  0x15   : > { %p659_p0 = scmp.ne.s32.totalorder %s848_s4, %s658_s9  ;;  %p660_p1 = pneg %p852_p13 }
  0x16   : > { %s663_s17 = scalar_lea.hbm %s998_s0, 2048  ;;  %p664_p4 = scmp.lt.u32.totalorder %s848_s4, %s998_s0 }
  0x17   : > { %p661_p2 = pnand %p660_p1, %p659_p0  ;;  %p665_p5 = scmp.lt.u32.totalorder %s663_s17, %s658_s9 }
  0x18   : > { %p667_p8 = scmp.lt.u32.totalorder %s658_s9, %s848_s4 }
  0x19   : > { %p662_p3 = pneg %p661_p2  ;;  %p666_p7 = por %p665_p5, %p664_p4 }
  0x1b   : > { %p668_p10 = por %p667_p8, %p666_p7 }
  0x1d   : > { %p669_p9 = pnand %p668_p10, %p662_p3 }
  0x1f   : > { %672 = shalt.err (!%p669_p9)
}
  0x20   : > { %s673_s22 = scalar_lea.vmem %s856_s6, 1024  ;;  %s756_s26 = smov [#allocation2]  }
  0x21   : > { %p674_p0 = scmp.ne.s32.totalorder %s856_s6, %s673_s22  ;;  %s678_s27 = sshll.u32 %s756_s26, 4  ;;  %s679_s27 = int_to_ptr.vmem [resolvable:$false] %s678_s27 }
  0x22   : > { %s680_s28 = scalar_lea.vmem %s679_s27, 2048  ;;  %p681_p11 = scmp.lt.s32.totalorder %s856_s6, %s679_s27 }
  0x23   : > { %p676_p2 = pnand %p674_p0, %p660_p1  ;;  %p682_p4 = scmp.lt.s32.totalorder %s680_s28, %s673_s22 }
  0x25   : > { %p677_p12 = pneg %p676_p2  ;;  %p683_p5 = por %p682_p4, %p681_p11 }
  0x27   : > { %p684_p7 = pnand %p683_p5, %p677_p12 }
  0x29   : > { %687 = shalt.err (!%p684_p7)
}
  0x2a   : > { %s757_s29 = smov 256   ;;  %s758_s30 = smov 16  }
  0x2b   : > { %608 = dma.hbm_to_vmem [thread:$0]  (!%p852_p13), %s848_s4, 1024, %s856_s6, %s858_s8, %s757_s29, %s757_s29, %s758_s30  }
  0x2c   : > { %p559_p9 = scmp.ge.s32.totalorder %s754_s15, 1  ;;  %p156_p1 = scmp.lt.s32.totalorder %s754_s15, 3 }
  0x2e   : > { %p157_p3 = pnand %p559_p9, %p156_p1 }
  0x2f   : > { %s889_s5 = sand.u32 (!%p157_p3), 1, %s746_s13  }
  0x30   : > { %160 = sbr.rel (%p157_p3) target bundleno = 810 (0x32a), region = 32  ;;  %s560_s9 = sshll.u32 (!%p157_p3), %s889_s5, 6 }
  0x31   : > { %s163_s10 = scalar_lea.sflag (!%p157_p3), [#allocation3], %s889_s5  ;;  %s166_s11 = scalar_lea.vmem (!%p157_p3), [#allocation2], %s560_s9 }
  0x37   : > { %733 = dma.done.wait (%p828_p6), %s163_s10, 1024  }
  0x38   : > { %735 = vsyncadd (%p828_p6), %s163_s10, 4294966272  ;;  %v899_v0 = vld [vmem:[%s166_s11] sm:$0xff]  ;;  %v901_v1 = vld [vmem:[%s166_s11 + $0x8] sm:$0xff]  ;;  %v759_v15 = vmov 0.0|0.0   ;;  %vm760_vm0 = vmmov 0   ;;  %v761_v19 = vmov 0.0   ;;  %v221_v20 = vlaneseq }
  0x39   : > { %v903_v2 = vld [vmem:[%s166_s11 + $0x20] sm:$0xff]  ;;  %v197_v3 = vadd.f32 %v901_v1, %v899_v0  ;;  %v907_v4 = vld [vmem:[%s166_s11 + $0x28] sm:$0xff]  ;;  %v909_v5 = vld [vmem:[%s166_s11 + $0x10] sm:$0xff]  ;;  %595 = vmatprep.subr.bf16.mxu0 %v759_v15  ;;  %587 = vmatprep.mubr.msk.f32.mxu0 %vm760_vm0, %v761_v19  ;;  %vm232_vm1 = vcmask 130112   ;;  %vm239_vm2 = vcmask 195712   ;;  %vm246_vm3 = vcmask 261312  }
  0x3a   : > { %v911_v6 = vld [vmem:[%s166_s11 + $0x18] sm:$0xff]  ;;  %v203_v7 = vadd.f32 %v907_v4, %v903_v2  ;;  %v915_v8 = vld [vmem:[%s166_s11 + $0x30] sm:$0xff]  ;;  %v213_v12 = vld [vmem:[%s999_s1] sm:$0xff]  ;;  %590 = vmatprep.subr.mxu1 %v761_v19  ;;  %592 = vmatprep.mubr.msk.f32.mxu1 %vm760_vm0, %v761_v19  ;;  %v222_v21 = vand.u32 127, %v221_v20  ;;  %v224_v22 = vshrl.u32 %v221_v20, 7  ;;  %vm248_vm4 = vcmask 261120  }
  0x3b   : > { %v917_v9 = vld [vmem:[%s166_s11 + $0x38] sm:$0xff]  ;;  %198 = vadd.xlane.f32.xlu0 %v197_v3  ;;  %v200_v10 = vadd.f32 %v911_v6, %v909_v5  ;;  %v214_v13 = vld [vmem:[%s999_s1 + $0x8] sm:$0xff]  ;;  %v215_v16 = vld [vmem:[%s999_s1 + $0x10] sm:$0xff]  ;;  %vm323_vm5 = vcmask 64512   ;;  %s188_s27 = scalar_lea.vmem [#allocation5], %s560_s9  ;;  %s571_s28 = sshll.u32 %s806_s16, 10 }
  0x3c   : > { %204 = vadd.xlane.f32.xlu1 %v203_v7  ;;  %v206_v11 = vadd.f32 %v917_v9, %v915_v8  ;;  %v596_v14 = vpack.c.bf16 %v214_v13, %v213_v12  ;;  %v216_v17 = vld [vmem:[%s999_s1 + $0x18] sm:$0xff]  ;;  %v227_v23 = vadd.s32 4294967288, %v222_v21  ;;  %v234_v25 = vadd.s32 4294967280, %v222_v21  ;;  %v322_v45 = vld [vmem:[%s1000_s2] sm:$0xff]  ;;  %s480_s29 = sshll.u32 %s188_s27, 4  ;;  %s952_s10 = scalar_lea.hbm %s1001_s3, %s571_s28  ;;  %s954_s29 = int_to_ptr.vmem [resolvable:$true] %s480_s29 }
  0x3d   : > { %v599_v18 = vpack.c.bf16 %v216_v17, %v215_v16  ;;  %v241_v26 = vadd.s32 4294967272, %v222_v21  ;;  %v225_v28 = vsub.s32 %v222_v21, %v224_v22  ;;  %591 = vmatpush3.msra.mxu1 %v322_v45  ;;  %v405_v49 = vsub.s32 0, %v224_v22  ;;  %s467_s16 = scalar_lea.sflag [#allocation4], %s889_s5  ;;  %s688_s11 = scalar_lea.vmem %s954_s29, 1024 }
  0x3e   : > { %597 = vmatpush3.bf16.msra.mxu0 %v596_v14  ;;  %v230_v30 = vsub.s32 %v227_v23, %v224_v22  ;;  %v237_v31 = vsub.s32 %v234_v25, %v224_v22  ;;  %p689_p6 = scmp.ne.s32.totalorder %s954_s29, %s688_s11  ;;  %p1008_p11 = scmp.ne.s32.totalorder %s1005_s24, 0 }
  0x3f   : > { %201 = vadd.xlane.f32.xlu0 %v200_v10  ;;  %598 = vmatprep.subr.bf16.mxu0 %v759_v15  ;;  %v244_v34 = vsub.s32 %v241_v26, %v224_v22  ;;  %s762_s23 = smov [#allocation5]  }
  0x40   : > { %207 = vadd.xlane.f32.xlu1 %v206_v11  ;;  %p690_p12 = pnand %p689_p6, %p1008_p11  ;;  %s692_s4 = sshll.u32 %s762_s23, 4  ;;  %s693_s4 = int_to_ptr.vmem [resolvable:$false] %s692_s4 }
  0x41   : > { %s694_s6 = scalar_lea.vmem %s693_s4, 2048  ;;  %p695_p8 = scmp.lt.s32.totalorder %s954_s29, %s693_s4 }
  0x42   : > { %600 = vmatpush3.bf16.msra.mxu0 %v599_v18  ;;  %p691_p13 = pneg %p690_p12  ;;  %p696_p10 = scmp.lt.s32.totalorder %s694_s6, %s688_s11 }
  0x44   : > { %p697_p0 = por %p696_p10, %p695_p8 }
  0x46   : > { %p698_p2 = pnand %p697_p0, %p691_p13 }
  0xc8   : > { %v199_v24 = vpop.xlane.xlu0 %198 }
  0xc9   : > { %v205_v27 = vpop.xlane.xlu1 %204  ;;  %v209_v29 = vmul.f32 0.00390625, %v199_v24 }
  0xca   : > { %v211_v32 = vmul.f32 0.00390625, %v205_v27 }
  0xcb   : > { %v226_v38 = vrot.slane %v209_v29, %v225_v28 }
  0xcc   : > { %v202_v33 = vpop.xlane.xlu0 %201  ;;  %v238_v40 = vrot.slane %v211_v32, %v237_v31 }
  0xcd   : > { %v210_v35 = vmul.f32 0.00390625, %v202_v33  ;;  %v208_v36 = vpop.xlane.xlu1 %207 }
  0xce   : > { %v212_v37 = vmul.f32 0.00390625, %v208_v36 }
  0xcf   : > { %v231_v39 = vrot.slane %v210_v35, %v230_v30 }
  0xd0   : > { %v245_v41 = vrot.slane %v212_v37, %v244_v34 }
  0xd1   : > { %v233_v42 = vsel %vm232_vm1, %v231_v39, %v226_v38 }
  0xd2   : > { %v240_v43 = vsel %vm239_vm2, %v238_v40, %v233_v42 }
  0xd3   : > { %v247_v44 = vsel %vm246_vm3, %v245_v41, %v240_v43 }
  0xd4   : > { %588 = vmatmul.mubr.msk.f32.vlgmr.msra.gmra.mrb[0].mxu0 %vm248_vm4, %v247_v44 }
 0x1a7   : > { %v317_v46 = vpop.f32.mrb[0].mxu0 }
 0x1a8   : > { %v321_v47 = vmax.f32 %v317_v46, 0.0  ;;  %v589_v48 = vpop.f32.mrb[1].mxu0 }
 0x1aa   : > { %593 = vmatmul.mubr.msk.f32.vlgmr.msra.gmra.mrb[0].mxu1 %vm323_vm5, %v321_v47 }
 0x27d   : > { %v393_v50 = vpop.f32.mrb[0].mxu1 }
 0x27e   : > { %v564_v51 = vmul.f32 -1.442695, %v393_v50  ;;  %v433_v52 = vrot.slane %v393_v50, %v405_v49  ;;  %v594_v53 = vpop.f32.mrb[1].mxu1 }
 0x280   : > { %654 = vpow2.f32 %v564_v51  ;;  %440 = vbcast.lane.b32.xlu1 %v433_v52, 296  ;;  %436 = vbcast.lane.b32.xlu0 %v433_v52, 288 }
 0x28a   : > { %v655_v54 = vpop.eup %654 }
 0x28b   : > { %v400_v55 = vadd.f32 1.0, %v655_v54 }
 0x28d   : > { %656 = vrcp.f32 %v400_v55 }
 0x297   : > { %v657_v56 = vpop.eup %656 }
 0x298   : > { %v406_v57 = vrot.slane %v657_v56, %v405_v49 }
 0x29a   : > { %412 = vbcast.lane.b32.xlu1 %v406_v57, 264  ;;  %408 = vbcast.lane.b32.xlu0 %v406_v57, 256 }
 0x29e   : > { %416 = vbcast.lane.b32.xlu1 %v406_v57, 272  ;;  %444 = vbcast.lane.b32.xlu0 %v433_v52, 304 }
 0x2a2   : > { %420 = vbcast.lane.b32.xlu1 %v406_v57, 280 }
 0x2a6   : > { %448 = vbcast.lane.b32.xlu1 %v433_v52, 312 }
 0x2f2   : > { %v441_v58 = vpop.permute.xlu1 %440  ;;  %v437_v59 = vpop.permute.xlu0 %436 }
 0x30c   : > { %v413_v60 = vpop.permute.xlu1 %412  ;;  %v409_v61 = vpop.permute.xlu0 %408 }
 0x30d   : > { %v424_v62 = vmul.f32 %v413_v60, %v909_v5  ;;  %v425_v63 = vmul.f32 %v413_v60, %v911_v6  ;;  %v422_v3 = vmul.f32 %v409_v61, %v899_v0  ;;  %v423_v7 = vmul.f32 %v409_v61, %v901_v1 }
 0x30f   : > { %v452_v10 = vadd.f32 %v441_v58, %v424_v62  ;;  %v453_v11 = vadd.f32 %v441_v58, %v425_v63  ;;  %v450_v12 = vadd.f32 %v437_v59, %v422_v3  ;;  %v451_v13 = vadd.f32 %v437_v59, %v423_v7 }
 0x310   : > { %v417_v14 = vpop.permute.xlu1 %416  ;;  %v445_v15 = vpop.permute.xlu0 %444 }
 0x311   : > { %460 = vst [vmem:[%s188_s27 + $0x10] sm:$0xff] %v452_v10  ;;  %461 = vst [vmem:[%s188_s27 + $0x18] sm:$0xff] %v453_v11  ;;  %v426_v5 = vmul.f32 %v417_v14, %v903_v2  ;;  %v427_v6 = vmul.f32 %v417_v14, %v907_v4 }
 0x312   : > { %458 = vst [vmem:[%s188_s27] sm:$0xff] %v450_v12  ;;  %459 = vst [vmem:[%s188_s27 + $0x8] sm:$0xff] %v451_v13 }
 0x313   : > { %v454_v0 = vadd.f32 %v445_v15, %v426_v5  ;;  %v455_v1 = vadd.f32 %v445_v15, %v427_v6 }
 0x314   : > { %v421_v16 = vpop.permute.xlu1 %420 }
 0x315   : > { %462 = vst [vmem:[%s188_s27 + $0x20] sm:$0xff] %v454_v0  ;;  %463 = vst [vmem:[%s188_s27 + $0x28] sm:$0xff] %v455_v1  ;;  %v428_v17 = vmul.f32 %v421_v16, %v915_v8  ;;  %v429_v18 = vmul.f32 %v421_v16, %v917_v9 }
 0x318   : > { %v449_v19 = vpop.permute.xlu1 %448 }
 0x319   : > { %v456_v2 = vadd.f32 %v449_v19, %v428_v17  ;;  %v457_v4 = vadd.f32 %v449_v19, %v429_v18 }
 0x31b   : > { %464 = vst [vmem:[%s188_s27 + $0x30] sm:$0xff] %v456_v2  ;;  %465 = vst [vmem:[%s188_s27 + $0x38] sm:$0xff] %v457_v4 }
 0x31c   : > { %701 = shalt.err (!%p698_p2)
}
 0x31d   : > { %s702_s7 = scalar_lea.hbm %s952_s10, 1024  ;;  %s706_s19 = scalar_lea.hbm %s1001_s3, 2048 }
 0x31e   : > { %p703_p4 = scmp.ne.s32.totalorder %s952_s10, %s702_s7  ;;  %p707_p9 = scmp.lt.u32.totalorder %s952_s10, %s1001_s3 }
 0x31f   : > { %p708_p1 = scmp.lt.u32.totalorder %s706_s19, %s702_s7  ;;  %p710_p6 = scmp.lt.u32.totalorder %s702_s7, %s952_s10 }
 0x320   : > { %p704_p5 = pnand %p703_p4, %p1008_p11 }
 0x321   : > { %p709_p3 = por %p708_p1, %p707_p9 }
 0x322   : > { %p705_p7 = pneg %p704_p5 }
 0x323   : > { %p711_p12 = por %p710_p6, %p709_p3 }
 0x325   : > { %p712_p13 = pnand %p711_p12, %p705_p7 }
 0x327   : > { %715 = shalt.err (!%p712_p13)
}
 0x328   : > { %s763_s26 = smov 256   ;;  %s764_s27 = smov 16  }
 0x329   : > { %603 = dma.vmem_to_hbm [thread:$0]  (%p1008_p11), %s954_s29, 1024, %s952_s10, %s467_s16, %s763_s26, %s763_s26, %s764_s27  }
 0x32a PF: > { %s495_s28 = sand.u32 1, %s742_s12   ;;  %p1009_p8 = scmp.ne.s32.totalorder %s1006_s25, 0 }
 0x32b   : > { %p1010_p10 = scmp.ge.s32.totalorder %s754_s15, 2  ;;  %s496_s30 = scalar_lea.sflag [#allocation4], %s495_s28 }
 0x32d   : > { %p610_p0 = pnand %p1010_p10, %p1009_p8 }
 0x32f   : > { %737 = dma.done.wait (!%p610_p0), %s496_s30, 1024  }
 0x330   : > { %739 = vsyncadd (!%p610_p0), %s496_s30, 4294966272  ;;  %p16_p2 = scmp.ge.s32.totalorder %s810_s18, 4   ;;  %s1011_s12 = smov %s746_s13 }
 0x331   : > { %s1012_s13 = smov %s750_s14  ;;  %s1013_s14 = smov %s822_s21 }
 0x332   : > { %s1014_s15 = smov %s810_s18  ;;  %18 = sbr.rel (!%p16_p2) target bundleno = 5 (0x5), region = 77 }
 0x339   :  { %501 = vsyncpa [#allocation3], 1 }
 0x33a   :  { %503 = vsyncpa [#allocation3 + $0x1], 1 }
 0x33b   :  { %504 = vsyncpa [#allocation4], 1 }
 0x33c   :  { %506 = vsyncpa [#allocation4 + $0x1], 1 }

</bundles_post_ra>
